<compile_context>
chip_gen: v6e
topology: v6e:2x2x1
jax: 0.10.0
libtpu: 0.0.40
codegen_flags: <defaults>
</compile_context>

<pallas_src>
import functools

import jax
import jax.numpy as jnp
from jax import lax
from jax.experimental import pallas as pl
from jax.experimental.pallas import tpu as pltpu


def _head_kernel(xp_ref, wc_ref, bc_ref, wfc_ref, bfc_ref, o_ref):
    # xp_ref : (BT, S+4, Hp) bf16 — sequence pre-padded with 2 zero rows/side,
    #                               hidden zero-padded to Hp (multiple of 128)
    # wc_ref : (5*Hp, Hp)    bf16 — fused im2col conv weight (tap-major rows)
    # bc_ref : (1, Hp)       f32  — fused conv bias (zero in padded columns)
    # wfc_ref: (Hp, Lp)      bf16 — fc weight, zero-padded to (Hp, Lp)
    # bfc_ref: (1, Lp)       f32
    # o_ref  : (BT, S, Lp)   f32  — lane-dense padded output
    BT, Sp, Hp = xp_ref.shape
    S = Sp - 4
    Lp = o_ref.shape[-1]

    # im2col: five shifted slabs read straight from VMEM (no full-tile hoist);
    # Hp % 128 == 0 so the lane-axis concat lands on vreg boundaries.
    slabs = [xp_ref[:, j:j + S, :] for j in range(5)]         # 5 x (BT, S, Hp)
    xcol = jnp.concatenate(slabs, axis=-1)                    # (BT, S, 5*Hp)
    xcol = xcol.reshape(BT * S, 5 * Hp)                       # free: S % 8 == 0

    # Single fused conv matmul, fp32 accumulation on the MXU.
    acc = jnp.dot(xcol, wc_ref[...],
                  preferred_element_type=jnp.float32)         # (BT*S, Hp)

    # Bias + ReLU in fp32 on the VPU (branches occupy disjoint output columns,
    # so ReLU commutes with the original concat).
    y = jnp.maximum(acc + bc_ref[...], 0.0)

    # fc: bf16 MXU matmul, fp32 accumulate, bias folded into the same value.
    out = jnp.dot(y.astype(wfc_ref.dtype), wfc_ref[...],
                  preferred_element_type=jnp.float32) + bfc_ref[...]

    # Single batched, lane-dense store.
    o_ref[...] = out.reshape(BT, S, Lp).astype(o_ref.dtype)


def _round_up(v, m):
    return (v + m - 1) // m * m


@functools.partial(jax.jit, static_argnames=("batch_tile",))
def custom_head_cnn(x, w1, b1, w3, b3, w5, b5, wfc, bfc, *, batch_tile=None):
    """x: (B, S, H); conv weights stored as (k, H, C); fc weight as (H, L)."""
    B, S, H = x.shape
    L = wfc.shape[1]
    C1, C3, C5 = w1.shape[2], w3.shape[2], w5.shape[2]
    if C1 + C3 + C5 != H:
        raise ValueError(
            "conv out_channels must sum to hidden_size (needs H % 3 == 1)")

    Hp = _round_up(H, 128)            # lane-aligned hidden
    Lp = _round_up(L, 128)            # lane-dense output

    if batch_tile is None:
        # >=2 grid steps when possible (v7x: 2 TensorCores on the 'parallel'
        # axis), per-step xp tile capped at ~8 MiB so double-buffered input +
        # resident weights + output stay inside v7x's 64 MiB physical VMEM.
        xp_bytes_per_batch = (S + 4) * Hp * 2                 # bf16
        cap = max(1, (8 * 1024 * 1024) // xp_bytes_per_batch)
        batch_tile = min(max(B // 2, 1), cap)
        while B % batch_tile:
            batch_tile -= 1
    if B % batch_tile != 0:
        raise ValueError("batch must be divisible by batch_tile")

    # --- fuse the three conv branches into one 5-tap im2col weight + bias ---
    # (runs as XLA ops inside jit; hoist out of the per-step path in prod if
    #  the conv/fc weights are static parameters)
    wc = jnp.zeros((5, Hp, Hp), jnp.float32)
    wc = wc.at[2, :H, :C1].set(w1[0])                  # k=1, pad=0 -> tap d=0
    wc = wc.at[1:4, :H, C1:C1 + C3].set(w3)            # k=3, pad=1 -> taps -1..1
    wc = wc.at[:, :H, C1 + C3:C1 + C3 + C5].set(w5)    # k=5, pad=2 -> taps -2..2
    wc = wc.reshape(5 * Hp, Hp).astype(jnp.bfloat16)   # tap-major im2col layout

    bc = jnp.zeros((1, Hp), jnp.float32)
    bc = bc.at[:, :H].set(jnp.concatenate([b1, b3, b5], axis=-1))

    wfc_p = jnp.zeros((Hp, Lp), jnp.float32).at[:H, :L].set(wfc)
    wfc_p = wfc_p.astype(jnp.bfloat16)
    bfc_p = jnp.zeros((1, Lp), jnp.float32).at[:, :L].set(bfc)

    # --- pre-pad sequence (and hidden) so the kernel only takes static slices
    xp = jnp.pad(x, ((0, 0), (2, 2), (0, Hp - H))).astype(jnp.bfloat16)

    full = lambda a: pl.BlockSpec(a.shape, lambda i: (0,) * a.ndim)
    out_p = pl.pallas_call(
        _head_kernel,
        out_shape=jax.ShapeDtypeStruct((B, S, Lp), jnp.float32),
        grid_spec=pltpu.PrefetchScalarGridSpec(
            num_scalar_prefetch=0,
            grid=(B // batch_tile,),
            in_specs=[
                pl.BlockSpec((batch_tile, S + 4, Hp), lambda i: (i, 0, 0)),
                full(wc), full(bc), full(wfc_p), full(bfc_p),
            ],
            out_specs=pl.BlockSpec((batch_tile, S, Lp), lambda i: (i, 0, 0)),
        ),
        compiler_params=pltpu.CompilerParams(
            dimension_semantics=("parallel",),
            vmem_limit_bytes=32 * 1024 * 1024,
        ),
    )(xp, wc, bc, wfc_p, bfc_p)

    return out_p[..., :L]


def _reference(x, w1, b1, w3, b3, w5, b5, wfc, bfc):
    """Pure-JAX fp32 reference mirroring the PyTorch forward (NCL convs)."""
    x_ncl = jnp.transpose(x, (0, 2, 1))  # (B, H, S)

    def conv(x_ncl, w_khc, b, pad):
        # lax expects kernel (O, I, K); our weights are stored (K, I, O)
        w_oik = jnp.transpose(w_khc, (2, 1, 0))
        y = lax.conv_general_dilated(
            x_ncl, w_oik, window_strides=(1,), padding=[(pad, pad)],
            dimension_numbers=("NCH", "OIH", "NCH"))
        y = y + b.reshape(1, -1, 1)
        return jax.nn.relu(jnp.transpose(y, (0, 2, 1)))   # (B, S, C)

    c1 = conv(x_ncl, w1, b1, 0)
    c3 = conv(x_ncl, w3, b3, 1)
    c5 = conv(x_ncl, w5, b5, 2)
    cat = jnp.concatenate([c1, c3, c5], axis=-1)
    return cat @ wfc + bfc


if __name__ == "__main__":
    B, S, H, L = 2, 16, 64, 4          # hidden % 3 == 1 -> 21 + 21 + 22 = 64
    C1, C3, C5 = H // 3, H // 3, H // 3 + 1

    key = jax.random.PRNGKey(0)
    ks = jax.random.split(key, 10)
    x = jax.random.normal(ks[0], (B, S, H), jnp.float32)

    # Deterministic synthetic parameters (conv weights stored as (k, in, out)).
    w1 = jax.random.normal(ks[1], (1, H, C1), jnp.float32) * 0.05
    b1 = jax.random.normal(ks[2], (1, C1), jnp.float32) * 0.05
    w3 = jax.random.normal(ks[3], (3, H, C3), jnp.float32) * 0.05
    b3 = jax.random.normal(ks[4], (1, C3), jnp.float32) * 0.05
    w5 = jax.random.normal(ks[5], (5, H, C5), jnp.float32) * 0.05
    b5 = jax.random.normal(ks[6], (1, C5), jnp.float32) * 0.05
    wfc = jax.random.normal(ks[7], (H, L), jnp.float32) * 0.05
    bfc = jax.random.normal(ks[8], (1, L), jnp.float32) * 0.05

    out = custom_head_cnn(x, w1, b1, w3, b3, w5, b5, wfc, bfc)
    out = jax.block_until_ready(out)

    ref = _reference(x, w1, b1, w3, b3, w5, b5, wfc, bfc)
    assert out.shape == (B, S, L), out.shape
    # bf16 matmul operands (fp32 accumulation) -> loosened tolerance vs fp32 ref.
    max_err = float(jnp.max(jnp.abs(out - ref)))
    assert jnp.allclose(out, ref, atol=2.5e-2, rtol=2.5e-2), max_err

    print("KERNEL_OK")
</pallas_src>

<mosaic_0001>
module attributes {stable_mosaic.version = 11 : i64} {
  func.func @_head_kernel(%arg0: i32, %arg1: memref<1x20x128xbf16, #tpu.memory_space<vmem>>, %arg2: memref<640x128xbf16, #tpu.memory_space<vmem>>, %arg3: memref<1x128xf32, #tpu.memory_space<vmem>>, %arg4: memref<128x128xbf16, #tpu.memory_space<vmem>>, %arg5: memref<1x128xf32, #tpu.memory_space<vmem>>, %arg6: memref<1x16x128xf32, #tpu.memory_space<vmem>>) attributes {dimension_semantics = [#tpu.dimension_semantics<parallel>], iteration_bounds = array<i64: 2>, scalar_prefetch = 0 : i64, scratch_operands = 0 : i64, tpu.core_type = #tpu.core_type<tc>, window_params = [{transform_indices = @transform_0, window_bounds = array<i64: 1, 20, 128>}, {pipeline_mode = #tpu.pipeline_mode<synchronous>, transform_indices = @transform_1, window_bounds = array<i64: 640, 128>}, {pipeline_mode = #tpu.pipeline_mode<synchronous>, transform_indices = @transform_2, window_bounds = array<i64: 1, 128>}, {pipeline_mode = #tpu.pipeline_mode<synchronous>, transform_indices = @transform_3, window_bounds = array<i64: 128, 128>}, {pipeline_mode = #tpu.pipeline_mode<synchronous>, transform_indices = @transform_4, window_bounds = array<i64: 1, 128>}, {transform_indices = @transform_5, window_bounds = array<i64: 1, 16, 128>}]} {
    %c0 = arith.constant 0 : index
    %c0_0 = arith.constant 0 : index
    %c0_1 = arith.constant 0 : index
    %0 = vector.load %arg1[%c0, %c0_0, %c0_1] : memref<1x20x128xbf16, #tpu.memory_space<vmem>>, vector<1x16x128xbf16>
    %c0_2 = arith.constant 0 : index
    %c1 = arith.constant 1 : index
    %c0_3 = arith.constant 0 : index
    %1 = vector.load %arg1[%c0_2, %c1, %c0_3] : memref<1x20x128xbf16, #tpu.memory_space<vmem>>, vector<1x16x128xbf16>
    %c0_4 = arith.constant 0 : index
    %c2 = arith.constant 2 : index
    %c0_5 = arith.constant 0 : index
    %2 = vector.load %arg1[%c0_4, %c2, %c0_5] : memref<1x20x128xbf16, #tpu.memory_space<vmem>>, vector<1x16x128xbf16>
    %c0_6 = arith.constant 0 : index
    %c3 = arith.constant 3 : index
    %c0_7 = arith.constant 0 : index
    %3 = vector.load %arg1[%c0_6, %c3, %c0_7] : memref<1x20x128xbf16, #tpu.memory_space<vmem>>, vector<1x16x128xbf16>
    %c0_8 = arith.constant 0 : index
    %c4 = arith.constant 4 : index
    %c0_9 = arith.constant 0 : index
    %4 = vector.load %arg1[%c0_8, %c4, %c0_9] : memref<1x20x128xbf16, #tpu.memory_space<vmem>>, vector<1x16x128xbf16>
    %5 = tpu.concatenate %0, %1, %2, %3, %4 in 2 : vector<1x16x128xbf16>, vector<1x16x128xbf16>, vector<1x16x128xbf16>, vector<1x16x128xbf16>, vector<1x16x128xbf16> -> vector<1x16x640xbf16>
    %6 = vector.shape_cast %5 : vector<1x16x640xbf16> to vector<16x640xbf16>
    %c0_10 = arith.constant 0 : index
    %c0_11 = arith.constant 0 : index
    %7 = vector.load %arg2[%c0_10, %c0_11] : memref<640x128xbf16, #tpu.memory_space<vmem>>, vector<640x128xbf16>
    %cst = arith.constant dense<0.000000e+00> : vector<16x128xf32>
    %8 = tpu.matmul %6, %7, %cst {dimension_numbers = #tpu.dot_dimension_numbers<[1], [0], [0], [1], [0, 0, 1, 1], [], []>} : vector<16x640xbf16>, vector<640x128xbf16>, vector<16x128xf32> -> vector<16x128xf32>
    %c0_12 = arith.constant 0 : index
    %c0_13 = arith.constant 0 : index
    %9 = vector.load %arg3[%c0_12, %c0_13] : memref<1x128xf32, #tpu.memory_space<vmem>>, vector<1x128xf32>
    %10 = vector.broadcast %9 : vector<1x128xf32> to vector<16x128xf32>
    %11 = arith.addf %8, %10 : vector<16x128xf32>
    %cst_14 = arith.constant 0.000000e+00 : f32
    %12 = vector.broadcast %cst_14 : f32 to vector<16x128xf32>
    %13 = arith.maximumf %11, %12 : vector<16x128xf32>
    %14 = arith.truncf %13 : vector<16x128xf32> to vector<16x128xbf16>
    %c0_15 = arith.constant 0 : index
    %c0_16 = arith.constant 0 : index
    %15 = vector.load %arg4[%c0_15, %c0_16] : memref<128x128xbf16, #tpu.memory_space<vmem>>, vector<128x128xbf16>
    %cst_17 = arith.constant dense<0.000000e+00> : vector<16x128xf32>
    %16 = tpu.matmul %14, %15, %cst_17 {dimension_numbers = #tpu.dot_dimension_numbers<[1], [0], [0], [1], [0, 0, 1, 1], [], []>} : vector<16x128xbf16>, vector<128x128xbf16>, vector<16x128xf32> -> vector<16x128xf32>
    %c0_18 = arith.constant 0 : index
    %c0_19 = arith.constant 0 : index
    %17 = vector.load %arg5[%c0_18, %c0_19] : memref<1x128xf32, #tpu.memory_space<vmem>>, vector<1x128xf32>
    %18 = vector.broadcast %17 : vector<1x128xf32> to vector<16x128xf32>
    %19 = arith.addf %16, %18 : vector<16x128xf32>
    %20 = vector.shape_cast %19 : vector<16x128xf32> to vector<1x16x128xf32>
    %c0_20 = arith.constant 0 : index
    %c0_21 = arith.constant 0 : index
    %c0_22 = arith.constant 0 : index
    %21 = vector.load %arg6[%c0_20, %c0_21, %c0_22] : memref<1x16x128xf32, #tpu.memory_space<vmem>>, vector<1x16x128xf32>
    tpu.vector_store %arg6[%c0_20, %c0_21, %c0_22], %20 {strides = array<i32>} : memref<1x16x128xf32, #tpu.memory_space<vmem>>, vector<1x16x128xf32>,
    return
  }
  func.func @transform_0(%arg0: i32) -> (i32, i32, i32) {
    %c0_i32 = arith.constant 0 : i32
    %c0_i32_0 = arith.constant 0 : i32
    %c0_i32_1 = arith.constant 0 : i32
    return %arg0, %c0_i32, %c0_i32_0 : i32, i32, i32
  }
  func.func @transform_1(%arg0: i32) -> (i32, i32) {
    %c0_i32 = arith.constant 0 : i32
    %c0_i32_0 = arith.constant 0 : i32
    %c0_i32_1 = arith.constant 0 : i32
    return %c0_i32, %c0_i32_0 : i32, i32
  }
  func.func @transform_2(%arg0: i32) -> (i32, i32) {
    %c0_i32 = arith.constant 0 : i32
    %c0_i32_0 = arith.constant 0 : i32
    %c0_i32_1 = arith.constant 0 : i32
    return %c0_i32, %c0_i32_0 : i32, i32
  }
  func.func @transform_3(%arg0: i32) -> (i32, i32) {
    %c0_i32 = arith.constant 0 : i32
    %c0_i32_0 = arith.constant 0 : i32
    %c0_i32_1 = arith.constant 0 : i32
    return %c0_i32, %c0_i32_0 : i32, i32
  }
  func.func @transform_4(%arg0: i32) -> (i32, i32) {
    %c0_i32 = arith.constant 0 : i32
    %c0_i32_0 = arith.constant 0 : i32
    %c0_i32_1 = arith.constant 0 : i32
    return %c0_i32, %c0_i32_0 : i32, i32
  }
  func.func @transform_5(%arg0: i32) -> (i32, i32, i32) {
    %c0_i32 = arith.constant 0 : i32
    %c0_i32_0 = arith.constant 0 : i32
    %c0_i32_1 = arith.constant 0 : i32
    return %arg0, %c0_i32, %c0_i32_0 : i32, i32, i32
  }
}

</mosaic_0001>

<bundles_post_ra>
// kernel: custom_head_cnn.1
= control target key start
LH: loop header
LB: loop body
LE: loop exit
PB: predicated region body
PF: predicated region fallthrough
CT: control target
= control target key end

     0   :  { %s1187_s18 = smov 0   ;;  %s1395_s0 = inlined_call_operand.vmem [shape: bf16[2,20,128], index: 0, kind: input, shape index: {}]   ;;  %s1396_s1 = inlined_call_operand.vmem [shape: bf16[640,128], index: 1, kind: input, shape index: {}]   ;;  %s1397_s2 = inlined_call_operand.vmem [shape: f32[1,128], index: 2, kind: input, shape index: {}]   ;;  %s1398_s3 = inlined_call_operand.vmem [shape: bf16[128,128], index: 3, kind: input, shape index: {}]   ;;  %s1399_s4 = inlined_call_operand.vmem [shape: f32[1,128], index: 4, kind: input, shape index: {}]   ;;  %s1400_s5 = inlined_call_operand.vmem [shape: f32[2,16,128], index: 5, kind: output, shape index: {}]  }
   0x1 LB: > { %s915_s19 = sadd.s32 4294967295, %s1153_s18   ;;  %p919_p0 = scmp.ge.s32.totalorder %s1153_s18, 1  ;;  %s1153_s18 = sphi %s1187_s18, %s15_s18  }
   0x2   : > { %p187_p1 = scmp.lt.s32.totalorder %s1153_s18, 3 }
   0x4   : > { %p188_p2 = pnand %p919_p0, %p187_p1 }
   0x5   : > { %p215_p3 = scmp.lt.s32.totalorder (!%p188_p2), %s915_s19, 1 }
   0x6   : > { %191 = sbr.rel (%p188_p2) target bundleno = 479 (0x1df), region = 40 }
   0xb   : > { %v1094_v0 = vld [vmem:[%s1396_s1 + $0x78] sm:$0xff]   ;;  %v1098_v4 = vld [vmem:[%s1396_s1 + $0x70] sm:$0xff]   ;;  %v1102_v8 = vld [vmem:[%s1396_s1 + $0x68] sm:$0xff]   ;;  %s1402_s19 = smov (!%p215_p3, %s915_s19), 1  ;;  %v1155_v36 = vmov 0.0   ;;  %vm258_vm0 = vcmask 1046528  }
   0xc   : > { %v1095_v1 = vld [vmem:[%s1396_s1 + $0x38] sm:$0xff]   ;;  %981 = vmatprep.subr.bf16.mxu0 %v1094_v0  ;;  %v1099_v5 = vld [vmem:[%s1396_s1 + $0x30] sm:$0xff]   ;;  %v1103_v9 = vld [vmem:[%s1396_s1 + $0x28] sm:$0xff]   ;;  %s1083_s24 = smul.u32 12, %s1402_s19  ;;  %vm241_vm1 = vsmask.f32 7424 }
   0xd   : > { %v1096_v2 = vld [vmem:[%s1396_s1 + $0xf8] sm:$0xff]   ;;  %982 = vmatpush3.bf16.msra.mxu0 %v1095_v1  ;;  %v1100_v6 = vld [vmem:[%s1396_s1 + $0xf0] sm:$0xff]   ;;  %v1104_v10 = vld [vmem:[%s1396_s1 + $0xe8] sm:$0xff]   ;;  %vm266_vm2 = vsmask.f32 6400  ;;  %vm1156_vm3 = vmmov 0  }
   0xe   : > { %v1097_v3 = vld [vmem:[%s1396_s1 + $0xb8] sm:$0xff]   ;;  %1003 = vmatprep.subr.bf16.mxu1 %v1096_v2  ;;  %983 = vmatprep.subr.bf16.mxu0 %v1098_v4  ;;  %v1101_v7 = vld [vmem:[%s1396_s1 + $0xb0] sm:$0xff]   ;;  %v1105_v11 = vld [vmem:[%s1396_s1 + $0xa8] sm:$0xff]   ;;  %s1292_s10 = scalar_lea.vmem %s1395_s0, %s1083_s24  ;;  %vm288_vm4 = vcmask 1045504   ;;  %s980_s30 = sshll.u32 %s1402_s19, 4 }
   0xf   : > { %1004 = vmatpush3.bf16.msra.mxu1 %v1097_v3  ;;  %v1106_v12 = vld [vmem:[%s1396_s1 + $0x60] sm:$0xff]   ;;  %v1110_v16 = vld [vmem:[%s1396_s1 + $0x58] sm:$0xff]   ;;  %v1114_v20 = vld [vmem:[%s1396_s1 + $0x50] sm:$0xff]  }
  0x10   : > { %1005 = vmatprep.subr.bf16.mxu1 %v1100_v6  ;;  %v1107_v13 = vld [vmem:[%s1396_s1 + $0x20] sm:$0xff]   ;;  %v1111_v17 = vld [vmem:[%s1396_s1 + $0x18] sm:$0xff]   ;;  %v1115_v21 = vld [vmem:[%s1396_s1 + $0x10] sm:$0xff]  }
  0x11   : > { %984 = vmatpush3.bf16.msra.mxu0 %v1099_v5  ;;  %v1108_v14 = vld [vmem:[%s1396_s1 + $0xe0] sm:$0xff]   ;;  %v1112_v18 = vld [vmem:[%s1396_s1 + $0xd8] sm:$0xff]   ;;  %v1116_v22 = vld [vmem:[%s1396_s1 + $0xd0] sm:$0xff]  }
  0x12   : > { %985 = vmatprep.subr.bf16.mxu0 %v1102_v8  ;;  %v1109_v15 = vld [vmem:[%s1396_s1 + $0xa0] sm:$0xff]   ;;  %v1113_v19 = vld [vmem:[%s1396_s1 + $0x98] sm:$0xff]   ;;  %v1117_v23 = vld [vmem:[%s1396_s1 + $0x90] sm:$0xff]  }
  0x13   : > { %1006 = vmatpush3.bf16.msra.mxu1 %v1101_v7  ;;  %v1118_v24 = vld [vmem:[%s1396_s1 + $0x48] sm:$0xff]   ;;  %v1122_v28 = vld [vmem:[%s1396_s1 + $0x40] sm:$0xff]   ;;  %v1130_v49 = vld [vmem:[%s1396_s1 + $0x138] sm:$0xff]  }
  0x14   : > { %1007 = vmatprep.subr.bf16.mxu1 %v1104_v10  ;;  %v1119_v25 = vld [vmem:[%s1396_s1 + $0x8] sm:$0xff]   ;;  %v1123_v29 = vld [vmem:[%s1396_s1] sm:$0xff]   ;;  %v1131_v62 = vld [vmem:[%s1396_s1 + $0x130] sm:$0xff]  }
  0x15   : > { %986 = vmatpush3.bf16.msra.mxu0 %v1103_v9  ;;  %v1120_v26 = vld [vmem:[%s1396_s1 + $0xc8] sm:$0xff]   ;;  %v1124_v30 = vld [vmem:[%s1396_s1 + $0xc0] sm:$0xff]   ;;  %v1134_v1 = vld [vmem:[%s1396_s1 + $0x118] sm:$0xff]  }
  0x16   : > { %987 = vmatprep.subr.bf16.mxu0 %v1106_v12  ;;  %v1121_v27 = vld [vmem:[%s1396_s1 + $0x88] sm:$0xff]   ;;  %v226_v31 = vld [vmem:[%s1292_s10] sm:$0xf]  ;;  %v1302_v32 = vld [vmem:[%s1292_s10 + $0x4] sm:$0xf] }
  0x17   : > { %1008 = vmatpush3.bf16.msra.mxu1 %v1105_v11  ;;  %v923_v33 = vcombine.low %v226_v31, %v1302_v32  ;;  %v1126_v34 = vld [vmem:[%s1292_s10 + $0x8] ss:$0 sps:$4 sm:$0x11]   ;;  %v1127_v35 = vld [vmem:[%s1396_s1 + $0x80] sm:$0xff]   ;;  %v1135_v2 = vld [vmem:[%s1396_s1 + $0x110] sm:$0xff]  }
  0x18   : > { %1009 = vmatprep.subr.bf16.mxu1 %v1108_v14  ;;  %v229_v37 = vld [vmem:[%s1292_s10] sm:$0xe]  ;;  %v250_v40 = vshll.u32 %v1126_v34, 16  ;;  %v1129_v42 = vld [vmem:[%s1292_s10 + $0x8] ss:$0 sps:$4 sm:$0x33]  }
  0x19   : > { %988 = vmatpush3.bf16.msra.mxu0 %v1107_v13  ;;  %v243_v38 = vshrl.u32 %v923_v33, 16  ;;  %v245_v39 = vshll.u32 %v923_v33, 16  ;;  %v925_v41 = vcombine.low %v229_v37, %v1302_v32  ;;  %v276_v47 = vshrl.u32 %v1129_v42, 16  ;;  %v1132_v63 = vld [vmem:[%s1396_s1 + $0x128] sm:$0xff]   ;;  %v1133_v0 = vld [vmem:[%s1396_s1 + $0x120] sm:$0xff]   ;;  %v1139_v10 = vld [vmem:[%s1398_s3 + $0x38] sm:$0xff]  }
  0x1a   : > { %989 = vmatprep.subr.bf16.mxu0 %v1110_v16  ;;  %v252_v44 = vrot.slane %v250_v40, 1  ;;  %v279_v48 = vshll.u32 %v1129_v42, 16  ;;  %v260_v51 = vrot.slane %v1126_v34, 1  ;;  %v231_v3 = vld [vmem:[%s1292_s10] sm:$0xc]  ;;  %v1136_v4 = vld [vmem:[%s1396_s1 + $0x108] sm:$0xff]   ;;  %s224_s10 = scalar_lea.vmem %s1400_s5, %s980_s30 }
  0x1b   : > { %1010 = vmatpush3.bf16.msra.mxu1 %v1109_v15  ;;  %v247_v43 = vrot.slane %v245_v39, 1  ;;  %v268_v45 = vshrl.u32 %v925_v41, 16  ;;  %v271_v46 = vshll.u32 %v925_v41, 16  ;;  %v259_v50 = vrot.slane %v925_v41, 1  ;;  %v1137_v6 = vld [vmem:[%s1396_s1 + $0x100] sm:$0xff]   ;;  %v1140_v11 = vld [vmem:[%s1398_s3 + $0x30] sm:$0xff]  }
  0x1c   : > { %1011 = vmatprep.subr.bf16.mxu1 %v1112_v18  ;;  %v278_v55 = vrot.slane %v276_v47, 1  ;;  %v281_v56 = vrot.slane %v279_v48, 2  ;;  %v927_v5 = vcombine.low %v231_v3, %v1302_v32  ;;  %v290_v8 = vrot.slane %v1129_v42, 2  ;;  %v1141_v12 = vld [vmem:[%s1398_s3 + $0x28] sm:$0xff]   ;;  %v1142_v13 = vld [vmem:[%s1398_s3 + $0x20] sm:$0xff]   ;;  %v1143_v14 = vld [vmem:[%s1398_s3 + $0x18] sm:$0xff]  }
  0x1d   : > { %990 = vmatpush3.bf16.msra.mxu0 %v1111_v17  ;;  %v248_v52 = vor.u32 %v247_v43, %v243_v38  ;;  %v270_v53 = vrot.slane %v268_v45, 1  ;;  %v273_v54 = vrot.slane %v271_v46, 2  ;;  %v261_v60 = vsel %vm258_vm0, %v259_v50, %v260_v51  ;;  %v1144_v15 = vld [vmem:[%s1398_s3 + $0x10] sm:$0xff]   ;;  %v1145_v16 = vld [vmem:[%s1398_s3 + $0x8] sm:$0xff]   ;;  %v1146_v17 = vld [vmem:[%s1398_s3] sm:$0xff]  }
  0x1e   : > { %991 = vmatprep.subr.bf16.mxu0 %v1114_v20  ;;  %v282_v59 = vor.u32 %v281_v56, %v278_v55  ;;  %v289_v7 = vrot.slane %v927_v5, 2 }
  0x1f   : > { %1012 = vmatpush3.bf16.msra.mxu1 %v1113_v19  ;;  %v253_v57 = vsel %vm241_vm1, %v248_v52, %v252_v44  ;;  %v274_v58 = vor.u32 %v273_v54, %v270_v53  ;;  %v969_v44 = vld [vmem:[%s1399_s4] ss:$0 sm:$0xff] }
  0x20   : > { %1013 = vmatprep.subr.bf16.mxu1 %v1116_v22  ;;  %652 = vmatprep.mubr.bf16.mxu0 %v253_v57  ;;  %v291_v9 = vsel %vm288_vm4, %v289_v7, %v290_v8 }
  0x21   : > { %992 = vmatpush3.bf16.msra.mxu0 %v1115_v21  ;;  %v283_v61 = vsel %vm266_vm2, %v274_v58, %v282_v59 }
  0x22   : > { %993 = vmatprep.subr.bf16.mxu0 %v1118_v24  ;;  %693 = vmatprep.mubr.bf16.mxu1 %v283_v61 }
  0x23   : > { %1014 = vmatpush3.bf16.msra.mxu1 %v1117_v23 }
  0x24   : > { %1015 = vmatprep.subr.bf16.mxu1 %v1120_v26  ;;  %v928_v26 = vld [vmem:[%s1397_s2] ss:$0 sm:$0xff] }
  0x25   : > { %994 = vmatpush3.bf16.msra.mxu0 %v1119_v25 }
  0x26   : > { %995 = vmatprep.subr.bf16.mxu0 %v1122_v28 }
  0x27   : > { %1016 = vmatpush3.bf16.msra.mxu1 %v1121_v27 }
  0x28   : > { %1017 = vmatprep.subr.bf16.mxu1 %v1124_v30 }
  0x29   : > { %996 = vmatpush3.bf16.msra.mxu0 %v1123_v29 }
  0x2a   : > { %1043 = vmatprep.subr.bf16.mxu0 %v1155_v36 }
  0x2b   : > { %1018 = vmatpush3.bf16.msra.mxu1 %v1127_v35 }
  0x2c   : > { %1063 = vmatprep.subr.bf16.mxu1 %v1155_v36  ;;  %653 = vmatmul.mubr.bf16.vlgmr.msra.gmra.mxu0 %v923_v33 }
  0x2d   : > { %1044 = vmatpush3.bf16.msra.mxu0 %v1130_v49  ;;  %1059 = vmatprep.mubr.msk.bf16.mxu0 %vm1156_vm3, %v1155_v36 }
  0x2e   : > { %1045 = vmatprep.subr.bf16.mxu0 %v1155_v36  ;;  %694 = vmatmul.mubr.bf16.vlgmr.msra.gmra.mxu1 %v261_v60 }
  0x2f   : > { %1079 = vmatprep.mubr.msk.bf16.mxu1 %vm1156_vm3, %v1155_v36  ;;  %1064 = vmatpush3.bf16.msra.mxu1 %v1139_v10 }
  0x30   : > { %1065 = vmatprep.subr.bf16.mxu1 %v1155_v36 }
  0x31   : > { %1046 = vmatpush3.bf16.msra.mxu0 %v1131_v62 }
  0x32   : > { %1047 = vmatprep.subr.bf16.mxu0 %v1155_v36 }
  0x33   : > { %1066 = vmatpush3.bf16.msra.mxu1 %v1140_v11 }
  0x34   : > { %1067 = vmatprep.subr.bf16.mxu1 %v1155_v36 }
  0x35   : > { %1048 = vmatpush3.bf16.msra.mxu0 %v1132_v63 }
  0x36   : > { %1049 = vmatprep.subr.bf16.mxu0 %v1155_v36 }
  0x37   : > { %1068 = vmatpush3.bf16.msra.mxu1 %v1141_v12 }
  0x38   : > { %1069 = vmatprep.subr.bf16.mxu1 %v1155_v36 }
  0x39   : > { %1050 = vmatpush3.bf16.msra.mxu0 %v1133_v0 }
  0x3a   : > { %1051 = vmatprep.subr.bf16.mxu0 %v1155_v36 }
  0x3b   : > { %1070 = vmatpush3.bf16.msra.mxu1 %v1142_v13 }
  0x3c   : > { %1071 = vmatprep.subr.bf16.mxu1 %v1155_v36 }
  0x3d   : > { %1052 = vmatpush3.bf16.msra.mxu0 %v1134_v1 }
  0x3e   : > { %1053 = vmatprep.subr.bf16.mxu0 %v1155_v36 }
  0x3f   : > { %1072 = vmatpush3.bf16.msra.mxu1 %v1143_v14 }
  0x40   : > { %1073 = vmatprep.subr.bf16.mxu1 %v1155_v36 }
  0x41   : > { %1054 = vmatpush3.bf16.msra.mxu0 %v1135_v2 }
  0x42   : > { %1055 = vmatprep.subr.bf16.mxu0 %v1155_v36 }
  0x43   : > { %1074 = vmatpush3.bf16.msra.mxu1 %v1144_v15 }
  0x44   : > { %1075 = vmatprep.subr.bf16.mxu1 %v1155_v36 }
  0x45   : > { %1056 = vmatpush3.bf16.msra.mxu0 %v1136_v4 }
  0x46   : > { %1057 = vmatprep.subr.bf16.mxu0 %v1155_v36 }
  0x47   : > { %1076 = vmatpush3.bf16.msra.mxu1 %v1145_v16 }
  0x48   : > { %1077 = vmatprep.subr.bf16.mxu1 %v1155_v36 }
  0x49   : > { %1058 = vmatpush3.bf16.msra.mxu0 %v1137_v6 }
  0x4b   : > { %1078 = vmatpush3.bf16.msra.mxu1 %v1146_v17 }
  0x4c   : > { %1060 = vmatmul.mubr.bf16.vlgmr.msra.gmra.mxu0 %v291_v9 }
  0xec   : > { %v997_v18 = vpop.f32.mrf.mxu0 }
  0xee   : > { %v998_v19 = vpop.f32.mrf.mxu0  ;;  %v1019_v20 = vpop.f32.mrf.mxu1 }
  0xef   : > { %v999_v25 = vadd.f32 %v998_v19, %v997_v18 }
  0xf0   : > { %v1000_v21 = vpop.f32.mrf.mxu0  ;;  %v1020_v22 = vpop.f32.mrf.mxu1 }
  0xf1   : > { %v655_v29 = vadd.f32 %v999_v25, %v928_v26  ;;  %v1021_v30 = vadd.f32 %v1020_v22, %v1019_v20 }
  0xf2   : > { %v1001_v23 = vpop.f32.mrf.mxu0  ;;  %v1022_v24 = vpop.f32.mrf.mxu1 }
  0xf3   : > { %v1002_v27 = vadd.f32 %v1001_v23, %v1000_v21  ;;  %v696_v34 = vadd.f32 %v1021_v30, %v655_v29 }
  0xf4   : > { %v1023_v28 = vpop.f32.mrf.mxu1 }
  0xf5   : > { %v658_v31 = vadd.f32 %v1002_v27, %v928_v26  ;;  %v1024_v32 = vadd.f32 %v1023_v28, %v1022_v24 }
  0xf7   : > { %v699_v37 = vadd.f32 %v1024_v32, %v658_v31 }
 0x10c   : > { %v736_v33 = vpop.f32.mrf.mxu0 }
 0x10d   : > { %v737_v36 = vadd.f32 %v736_v33, %v696_v34 }
 0x10e   : > { %v1061_v35 = vpop.f32.mrf.mxu0 }
 0x10f   : > { %v743_v41 = vmax.f32 %v737_v36, 0.0 }
 0x110   : > { %v739_v38 = vpop.f32.mrf.mxu0 }
 0x111   : > { %v740_v39 = vadd.f32 %v739_v38, %v699_v37 }
 0x112   : > { %v1062_v40 = vpop.f32.mrf.mxu0 }
 0x113   : > { %v744_v42 = vmax.f32 %v740_v39, 0.0 }
 0x115   : > { %v745_v43 = vpack.c.bf16 %v744_v42, %v743_v41 }
 0x117   : > { %1080 = vmatmul.mubr.bf16.vlgmr.msra.gmra.mxu1 %v745_v43 }
 0x1d7   : > { %v851_v45 = vpop.f32.mrf.mxu1 }
 0x1d8   : > { %v852_v46 = vadd.f32 %v969_v44, %v851_v45 }
 0x1d9   : > { %v1081_v47 = vpop.f32.mrf.mxu1 }
 0x1da   : > { %858 = vst [vmem:[%s224_s10] sm:$0xff] %v852_v46 }
 0x1db   : > { %v854_v48 = vpop.f32.mrf.mxu1 }
 0x1dc   : > { %v855_v49 = vadd.f32 %v969_v44, %v854_v48 }
 0x1dd   : > { %v1082_v50 = vpop.f32.mrf.mxu1 }
 0x1de   : > { %859 = vst [vmem:[%s224_s10 + $0x8] sm:$0xff] %v855_v49 }
 0x1df PF: > { %s15_s18 = sadd.s32 1, %s1153_s18  }
 0x1e0   : > { %p12_p4 = scmp.ge.s32.totalorder %s15_s18, 4  }
 0x1e2   :  { %14 = sbr.rel (!%p12_p4) target bundleno = 1 (0x1), region = 70 }

</bundles_post_ra>
